<compile_context>
chip_gen: v7x
topology: tpu7x:2x2x1
jax: 0.10.0
libtpu: 0.0.40
codegen_flags: <defaults>
</compile_context>

<pallas_src>
import functools

import numpy as np
import jax
import jax.numpy as jnp
from jax.experimental import pallas as pl
from jax.experimental.pallas import tpu as pltpu


_PAD0 = 8  # sublane-aligned zero-padding rows at the edges of the scratch bufs


# ---------------------------------------------------------------------------
# Fused encoder kernel: 4 MXU matmuls, everything resident in VMEM/vregs.
# ---------------------------------------------------------------------------
def _encoder_kernel(p1_ref, w1_ref, b1_ref, w2_ref, b2_ref, w3_ref, b3_ref,
                    wt_ref, bt_ref, o_ref, s1_ref, s2_ref,
                    *, n, h1, h2, compute_dtype):
    f32 = jnp.float32
    cd = compute_dtype
    g = n * h2                      # rows of every post-conv2 activation
    half = n * (h1 // 2)            # rows in the odd / even parity block

    def mm(a, b):                   # MXU matmul, f32 accumulation
        return jnp.dot(a.astype(cd), b.astype(cd), preferred_element_type=f32)

    # ---- strided_conv_1: ONE matmul (all 16 taps folded) ------------------
    a1 = mm(p1_ref[...], w1_ref[...]) + b1_ref[...]           # (n*h1, W1*Ch)

    # scatter the parity-ordered conv1 rows into a zero-padded scratch
    s1_ref[...] = jnp.zeros(s1_ref.shape, f32)
    s1_ref[pl.ds(_PAD0, n * h1), :] = a1

    # ---- strided_conv_2: fold the 4 dy taps along lanes -> ONE matmul -----
    # slice starts correspond to taps dy = 0, 2 (odd-row region) then 1, 3
    # (even-row region); w2_ref stacks the weight blocks in the same order.
    starts2 = (_PAD0 - n, _PAD0, _PAD0 + half, _PAD0 + half + n)
    lhs2 = jnp.concatenate([s1_ref[pl.ds(s, g), :] for s in starts2], axis=1)
    a2 = jnp.maximum(mm(lhs2, w2_ref[...]) + b2_ref[...], 0.0)  # (g, W2*Ch)

    # ---- residual_conv_1 (+x folded into centre tap) + ReLU ---------------
    s2_ref[...] = jnp.zeros(s2_ref.shape, f32)
    s2_ref[pl.ds(_PAD0, g), :] = a2
    lhs3 = jnp.concatenate(
        [s2_ref[pl.ds(_PAD0 + n * (dy - 1), g), :] for dy in range(3)], axis=1)
    a3 = jnp.maximum(mm(lhs3, w3_ref[...]) + b3_ref[...], 0.0)

    # ---- residual_conv_2 + residual + proj, pre-fused into one weight -----
    o_ref[...] = (mm(a3, wt_ref[...]) + bt_ref[...]).astype(o_ref.dtype)


# ---------------------------------------------------------------------------
# One-time weight preparation (f32 numpy, trace-time constants).
# ---------------------------------------------------------------------------
def _prepare_operands(params, input_hw):
    f32 = np.float32
    w1 = np.asarray(params["w1"], f32); b1 = np.asarray(params["b1"], f32)
    w2 = np.asarray(params["w2"], f32); b2 = np.asarray(params["b2"], f32)
    w3 = np.asarray(params["w3"], f32); b3 = np.asarray(params["b3"], f32)
    w4 = np.asarray(params["w4"], f32); b4 = np.asarray(params["b4"], f32)
    wp = np.asarray(params["wp"], f32); bp = np.asarray(params["bp"], f32)

    ch, cin = w1.shape[0], w1.shape[1]
    cout = wp.shape[0]
    k1, k2, k3 = w1.shape[2], w2.shape[2], w3.shape[2]
    H, W = input_hw
    assert k1 == 4 and k2 == 4 and k3 == 3
    assert w4.shape[2] == 1 and wp.shape[2] == 1
    assert H % 4 == 0 and W % 4 == 0
    wpd = W + 2                       # padded input width
    w1o, w2o = W // 2, W // 4         # conv1 / conv2 output widths
    cp = max(cout, max(1, 128 // w2o))  # lane-dense padded output channels

    # strided_conv_1: block-Toeplitz over x (kx), ky folded into the K rows.
    w1row = np.zeros((k1 * wpd * cin, w1o * ch), f32)
    for ky in range(k1):
        for x1 in range(w1o):
            for kx in range(k1):
                xp = 2 * x1 + kx
                r0 = (ky * wpd + xp) * cin
                w1row[r0:r0 + cin, x1 * ch:(x1 + 1) * ch] = w1[:, :, ky, kx].T
    b1row = np.tile(b1, w1o)[None, :]

    # strided_conv_2: per-dy block-Toeplitz over x, stacked in the kernel's
    # slice order (dy = 0, 2 from the odd-row region, then 1, 3 from the even).
    w2blk = np.zeros((k2, w1o * ch, w2o * ch), f32)
    for dy in range(k2):
        for ox in range(w2o):
            for dx in range(k2):
                x1 = 2 * ox + dx - 1
                if 0 <= x1 < w1o:
                    w2blk[dy, x1 * ch:(x1 + 1) * ch, ox * ch:(ox + 1) * ch] = \
                        w2[:, :, dy, dx].T
    w2s = np.concatenate([w2blk[dy] for dy in (0, 2, 1, 3)], axis=0)
    b2row = np.tile(b2, w2o)[None, :]

    # residual_conv_1 with the "+x" residual folded into the centre tap.
    w3e = w3.copy()
    w3e[:, :, k3 // 2, k3 // 2] += np.eye(ch, dtype=f32)
    w3blk = np.zeros((k3, w2o * ch, w2o * ch), f32)
    for dy in range(k3):
        for ox in range(w2o):
            for dx in range(k3):
                x2 = ox + dx - 1
                if 0 <= x2 < w2o:
                    w3blk[dy, x2 * ch:(x2 + 1) * ch, ox * ch:(ox + 1) * ch] = \
                        w3e[:, :, dy, dx].T
    w3s = np.concatenate([w3blk[dy] for dy in range(k3)], axis=0)
    b3row = np.tile(b3, w2o)[None, :]

    # residual_conv_2 + residual + proj fused:
    #   y = a3 @ ((W4 + I) @ Wp) + (b4 @ Wp + bp)      (composed in f32)
    w4m = w4[:, :, 0, 0].T                      # (ch, ch)
    wpm = wp[:, :, 0, 0].T                      # (ch, cout)
    mfused = (w4m + np.eye(ch, dtype=f32)) @ wpm
    mpad = np.zeros((ch, cp), f32); mpad[:, :cout] = mfused
    btpos = np.zeros((cp,), f32); btpos[:cout] = b4 @ wpm + bp
    wt = np.zeros((w2o * ch, w2o * cp), f32)
    for ox in range(w2o):
        wt[ox * ch:(ox + 1) * ch, ox * cp:(ox + 1) * cp] = mpad
    bt = np.tile(btpos, w2o)[None, :]

    ops = dict(w1row=w1row, b1row=b1row, w2s=w2s, b2row=b2row,
               w3s=w3s, b3row=b3row, wt=wt, bt=bt)
    ops = {k: jnp.asarray(v) for k, v in ops.items()}
    meta = dict(ch=ch, cin=cin, cout=cout, cp=cp, k1=k1, H=H, W=W)
    return ops, meta


# ---------------------------------------------------------------------------
# Forward factory: one jit'ed wrapper, one pallas_call, minimal layout glue.
# ---------------------------------------------------------------------------
def make_encoder_forward(params, input_hw, compute_dtype=jnp.float32):
    ops, meta = _prepare_operands(params, input_hw)
    H, W = meta["H"], meta["W"]
    cin, ch = meta["cin"], meta["ch"]
    cout, cp, k1 = meta["cout"], meta["cp"], meta["k1"]
    h1, w1o = H // 2, W // 2
    h2, w2o = H // 4, W // 4

    @jax.jit
    def forward(x):
        n = x.shape[0]
        assert x.shape == (n, cin, H, W) and n <= _PAD0
        g = n * h2

        # Input layout: pad, take the 4-row window of each conv1 output row and
        # order rows (odd y1 first, then even, image-minor) so conv2's stride-2
        # row taps become plain contiguous slices inside the kernel.
        xpad = jnp.pad(jnp.transpose(x, (0, 2, 3, 1)),
                       ((0, 0), (1, 1), (1, 1), (0, 0)))       # (n, H+2, W+2, cin)
        order = [2 * h + 1 for h in range(h1 // 2)] + \
                [2 * h for h in range(h1 // 2)]
        wins = jnp.stack([xpad[:, 2 * y1:2 * y1 + k1] for y1 in order], axis=1)
        wins = jnp.transpose(wins, (1, 0, 2, 3, 4))            # (h1, n, k1, W+2, cin)
        p1 = wins.reshape(n * h1, k1 * (W + 2) * cin)

        kernel = functools.partial(_encoder_kernel, n=n, h1=h1, h2=h2,
                                   compute_dtype=compute_dtype)
        raw = pl.pallas_call(
            kernel,
            out_shape=jax.ShapeDtypeStruct((g, w2o * cp), jnp.float32),
            scratch_shapes=[
                pltpu.VMEM((2 * _PAD0 + n * h1, w1o * ch), jnp.float32),
                pltpu.VMEM((2 * _PAD0 + g, w2o * ch), jnp.float32),
            ],
        )(p1, ops["w1row"], ops["b1row"], ops["w2s"], ops["b2row"],
          ops["w3s"], ops["b3row"], ops["wt"], ops["bt"])

        out = raw.reshape(h2, n, w2o, cp)
        out = jnp.transpose(out, (1, 3, 0, 2))[:, :cout]       # -> NCHW
        return out

    return forward


# ---------------------------------------------------------------------------
# Pure-JAX reference (lax.conv) for correctness checking.
# ---------------------------------------------------------------------------
def _conv_ref(x, w, b, stride, padding):
    out = jax.lax.conv_general_dilated(
        x, w, (stride, stride),
        [(padding, padding), (padding, padding)],
        dimension_numbers=("NCHW", "OIHW", "NCHW"))
    return out + b.reshape(1, -1, 1, 1)


def encoder_ref(x, p):
    x = _conv_ref(x, p["w1"], p["b1"], 2, 1)
    x = _conv_ref(x, p["w2"], p["b2"], 2, 1)
    x = jax.nn.relu(x)
    y = _conv_ref(x, p["w3"], p["b3"], 1, 1) + x
    x = jax.nn.relu(y)
    y = _conv_ref(x, p["w4"], p["b4"], 1, 0) + x
    return _conv_ref(y, p["wp"], p["bp"], 1, 0)


# ---------------------------------------------------------------------------
if __name__ == "__main__":
    input_dim, hidden_dim, output_dim = 4, 32, 8
    N, H, W = 2, 16, 16

    key = jax.random.PRNGKey(0)
    ks = jax.random.split(key, 11)

    def winit(k, shape, scale=0.1):
        return (scale * jax.random.normal(k, shape)).astype(jnp.float32)

    params = {
        "w1": winit(ks[0], (hidden_dim, input_dim, 4, 4)),
        "b1": winit(ks[1], (hidden_dim,)),
        "w2": winit(ks[2], (hidden_dim, hidden_dim, 4, 4)),
        "b2": winit(ks[3], (hidden_dim,)),
        "w3": winit(ks[4], (hidden_dim, hidden_dim, 3, 3)),
        "b3": winit(ks[5], (hidden_dim,)),
        "w4": winit(ks[6], (hidden_dim, hidden_dim, 1, 1)),
        "b4": winit(ks[7], (hidden_dim,)),
        "wp": winit(ks[8], (output_dim, hidden_dim, 1, 1)),
        "bp": winit(ks[9], (output_dim,)),
    }

    x = jax.random.normal(ks[10], (N, input_dim, H, W), dtype=jnp.float32)

    ref = jax.block_until_ready(encoder_ref(x, params))

    # f32 path.  Tolerance 2e-2 covers possible reduced-precision MXU passes
    # under the default TPU matmul precision (both for the kernel and the XLA
    # reference); any structural/indexing error would be orders of magnitude
    # larger than this.
    fwd_f32 = make_encoder_forward(params, (H, W), compute_dtype=jnp.float32)
    out_f32 = jax.block_until_ready(fwd_f32(x))
    assert out_f32.shape == (N, output_dim, H // 4, W // 4), out_f32.shape
    assert np.allclose(np.asarray(out_f32), np.asarray(ref),
                       rtol=2e-2, atol=2e-2)

    # bf16 MXU operands, f32 accumulation (loose sanity tolerance).
    fwd_bf16 = make_encoder_forward(params, (H, W), compute_dtype=jnp.bfloat16)
    out_bf16 = jax.block_until_ready(fwd_bf16(x))
    assert out_bf16.shape == (N, output_dim, H // 4, W // 4), out_bf16.shape
    assert np.allclose(np.asarray(out_bf16), np.asarray(ref),
                       rtol=1e-1, atol=1e-1)

    print("KERNEL_OK")
</pallas_src>

<mosaic_0001>
module attributes {stable_mosaic.version = 11 : i64} {
  func.func @_encoder_kernel(%arg0: memref<16x288xf32, #tpu.memory_space<vmem>>, %arg1: memref<288x256xf32, #tpu.memory_space<vmem>>, %arg2: memref<1x256xf32, #tpu.memory_space<vmem>>, %arg3: memref<1024x128xf32, #tpu.memory_space<vmem>>, %arg4: memref<1x128xf32, #tpu.memory_space<vmem>>, %arg5: memref<384x128xf32, #tpu.memory_space<vmem>>, %arg6: memref<1x128xf32, #tpu.memory_space<vmem>>, %arg7: memref<128x128xf32, #tpu.memory_space<vmem>>, %arg8: memref<1x128xf32, #tpu.memory_space<vmem>>, %arg9: memref<8x128xf32, #tpu.memory_space<vmem>>, %arg10: memref<32x256xf32, #tpu.memory_space<vmem>>, %arg11: memref<24x128xf32, #tpu.memory_space<vmem>>) attributes {dimension_semantics = [], scalar_prefetch = 0 : i64, scratch_operands = 2 : i64, tpu.core_type = #tpu.core_type<tc>} {
    %c0 = arith.constant 0 : index
    %c0_0 = arith.constant 0 : index
    %0 = vector.load %arg0[%c0, %c0_0] : memref<16x288xf32, #tpu.memory_space<vmem>>, vector<16x288xf32>
    %c0_1 = arith.constant 0 : index
    %c0_2 = arith.constant 0 : index
    %1 = vector.load %arg1[%c0_1, %c0_2] : memref<288x256xf32, #tpu.memory_space<vmem>>, vector<288x256xf32>
    %cst = arith.constant dense<0.000000e+00> : vector<16x256xf32>
    %2 = tpu.matmul %0, %1, %cst {dimension_numbers = #tpu.dot_dimension_numbers<[1], [0], [0], [1], [0, 0, 1, 1], [], []>} : vector<16x288xf32>, vector<288x256xf32>, vector<16x256xf32> -> vector<16x256xf32>
    %c0_3 = arith.constant 0 : index
    %c0_4 = arith.constant 0 : index
    %3 = vector.load %arg2[%c0_3, %c0_4] : memref<1x256xf32, #tpu.memory_space<vmem>>, vector<1x256xf32>
    %4 = vector.broadcast %3 : vector<1x256xf32> to vector<16x256xf32>
    %5 = arith.addf %2, %4 : vector<16x256xf32>
    %cst_5 = arith.constant 0.000000e+00 : f32
    %6 = vector.broadcast %cst_5 : f32 to vector<32x256xf32>
    %c0_6 = arith.constant 0 : index
    %c0_7 = arith.constant 0 : index
    %7 = vector.load %arg10[%c0_6, %c0_7] : memref<32x256xf32, #tpu.memory_space<vmem>>, vector<32x256xf32>
    tpu.vector_store %arg10[%c0_6, %c0_7], %6 {strides = array<i32>} : memref<32x256xf32, #tpu.memory_space<vmem>>, vector<32x256xf32>,
    %c8 = arith.constant 8 : index
    %c0_8 = arith.constant 0 : index
    %8 = vector.load %arg10[%c8, %c0_8] : memref<32x256xf32, #tpu.memory_space<vmem>>, vector<16x256xf32>
    tpu.vector_store %arg10[%c8, %c0_8], %5 {strides = array<i32>} : memref<32x256xf32, #tpu.memory_space<vmem>>, vector<16x256xf32>,
    %c6 = arith.constant 6 : index
    %c0_9 = arith.constant 0 : index
    %9 = vector.load %arg10[%c6, %c0_9] : memref<32x256xf32, #tpu.memory_space<vmem>>, vector<8x256xf32>
    %c8_10 = arith.constant 8 : index
    %c0_11 = arith.constant 0 : index
    %10 = vector.load %arg10[%c8_10, %c0_11] : memref<32x256xf32, #tpu.memory_space<vmem>>, vector<8x256xf32>
    %c16 = arith.constant 16 : index
    %c0_12 = arith.constant 0 : index
    %11 = vector.load %arg10[%c16, %c0_12] : memref<32x256xf32, #tpu.memory_space<vmem>>, vector<8x256xf32>
    %c18 = arith.constant 18 : index
    %c0_13 = arith.constant 0 : index
    %12 = vector.load %arg10[%c18, %c0_13] : memref<32x256xf32, #tpu.memory_space<vmem>>, vector<8x256xf32>
    %13 = tpu.concatenate %9, %10, %11, %12 in 1 : vector<8x256xf32>, vector<8x256xf32>, vector<8x256xf32>, vector<8x256xf32> -> vector<8x1024xf32>
    %c0_14 = arith.constant 0 : index
    %c0_15 = arith.constant 0 : index
    %14 = vector.load %arg3[%c0_14, %c0_15] : memref<1024x128xf32, #tpu.memory_space<vmem>>, vector<1024x128xf32>
    %cst_16 = arith.constant dense<0.000000e+00> : vector<8x128xf32>
    %15 = tpu.matmul %13, %14, %cst_16 {dimension_numbers = #tpu.dot_dimension_numbers<[1], [0], [0], [1], [0, 0, 1, 1], [], []>} : vector<8x1024xf32>, vector<1024x128xf32>, vector<8x128xf32> -> vector<8x128xf32>
    %c0_17 = arith.constant 0 : index
    %c0_18 = arith.constant 0 : index
    %16 = vector.load %arg4[%c0_17, %c0_18] : memref<1x128xf32, #tpu.memory_space<vmem>>, vector<1x128xf32>
    %17 = vector.broadcast %16 : vector<1x128xf32> to vector<8x128xf32>
    %18 = arith.addf %15, %17 : vector<8x128xf32>
    %cst_19 = arith.constant 0.000000e+00 : f32
    %19 = vector.broadcast %cst_19 : f32 to vector<8x128xf32>
    %20 = arith.maximumf %18, %19 : vector<8x128xf32>
    %cst_20 = arith.constant 0.000000e+00 : f32
    %21 = vector.broadcast %cst_20 : f32 to vector<24x128xf32>
    %c0_21 = arith.constant 0 : index
    %c0_22 = arith.constant 0 : index
    %22 = vector.load %arg11[%c0_21, %c0_22] : memref<24x128xf32, #tpu.memory_space<vmem>>, vector<24x128xf32>
    tpu.vector_store %arg11[%c0_21, %c0_22], %21 {strides = array<i32>} : memref<24x128xf32, #tpu.memory_space<vmem>>, vector<24x128xf32>,
    %c8_23 = arith.constant 8 : index
    %c0_24 = arith.constant 0 : index
    %23 = vector.load %arg11[%c8_23, %c0_24] : memref<24x128xf32, #tpu.memory_space<vmem>>, vector<8x128xf32>
    tpu.vector_store %arg11[%c8_23, %c0_24], %20 {strides = array<i32>} : memref<24x128xf32, #tpu.memory_space<vmem>>, vector<8x128xf32>,
    %c6_25 = arith.constant 6 : index
    %c0_26 = arith.constant 0 : index
    %24 = vector.load %arg11[%c6_25, %c0_26] : memref<24x128xf32, #tpu.memory_space<vmem>>, vector<8x128xf32>
    %c8_27 = arith.constant 8 : index
    %c0_28 = arith.constant 0 : index
    %25 = vector.load %arg11[%c8_27, %c0_28] : memref<24x128xf32, #tpu.memory_space<vmem>>, vector<8x128xf32>
    %c10 = arith.constant 10 : index
    %c0_29 = arith.constant 0 : index
    %26 = vector.load %arg11[%c10, %c0_29] : memref<24x128xf32, #tpu.memory_space<vmem>>, vector<8x128xf32>
    %27 = tpu.concatenate %24, %25, %26 in 1 : vector<8x128xf32>, vector<8x128xf32>, vector<8x128xf32> -> vector<8x384xf32>
    %c0_30 = arith.constant 0 : index
    %c0_31 = arith.constant 0 : index
    %28 = vector.load %arg5[%c0_30, %c0_31] : memref<384x128xf32, #tpu.memory_space<vmem>>, vector<384x128xf32>
    %cst_32 = arith.constant dense<0.000000e+00> : vector<8x128xf32>
    %29 = tpu.matmul %27, %28, %cst_32 {dimension_numbers = #tpu.dot_dimension_numbers<[1], [0], [0], [1], [0, 0, 1, 1], [], []>} : vector<8x384xf32>, vector<384x128xf32>, vector<8x128xf32> -> vector<8x128xf32>
    %c0_33 = arith.constant 0 : index
    %c0_34 = arith.constant 0 : index
    %30 = vector.load %arg6[%c0_33, %c0_34] : memref<1x128xf32, #tpu.memory_space<vmem>>, vector<1x128xf32>
    %31 = vector.broadcast %30 : vector<1x128xf32> to vector<8x128xf32>
    %32 = arith.addf %29, %31 : vector<8x128xf32>
    %cst_35 = arith.constant 0.000000e+00 : f32
    %33 = vector.broadcast %cst_35 : f32 to vector<8x128xf32>
    %34 = arith.maximumf %32, %33 : vector<8x128xf32>
    %c0_36 = arith.constant 0 : index
    %c0_37 = arith.constant 0 : index
    %35 = vector.load %arg7[%c0_36, %c0_37] : memref<128x128xf32, #tpu.memory_space<vmem>>, vector<128x128xf32>
    %cst_38 = arith.constant dense<0.000000e+00> : vector<8x128xf32>
    %36 = tpu.matmul %34, %35, %cst_38 {dimension_numbers = #tpu.dot_dimension_numbers<[1], [0], [0], [1], [0, 0, 1, 1], [], []>} : vector<8x128xf32>, vector<128x128xf32>, vector<8x128xf32> -> vector<8x128xf32>
    %c0_39 = arith.constant 0 : index
    %c0_40 = arith.constant 0 : index
    %37 = vector.load %arg8[%c0_39, %c0_40] : memref<1x128xf32, #tpu.memory_space<vmem>>, vector<1x128xf32>
    %38 = vector.broadcast %37 : vector<1x128xf32> to vector<8x128xf32>
    %39 = arith.addf %36, %38 : vector<8x128xf32>
    %c0_41 = arith.constant 0 : index
    %c0_42 = arith.constant 0 : index
    %40 = vector.load %arg9[%c0_41, %c0_42] : memref<8x128xf32, #tpu.memory_space<vmem>>, vector<8x128xf32>
    tpu.vector_store %arg9[%c0_41, %c0_42], %39 {strides = array<i32>} : memref<8x128xf32, #tpu.memory_space<vmem>>, vector<8x128xf32>,
    return
  }
}

</mosaic_0001>

<bundles_post_ra>
// kernel: forward.1
= control target key start
LH: loop header
LB: loop body
LE: loop exit
PB: predicated region body
PF: predicated region fallthrough
CT: control target
= control target key end

     0   :  { %v1656_v3 = vmov 0.0   ;;  %vm122_vm0 = vcmask 261120   ;;  %vm465_vm1 = vcmask 1041408   ;;  %vm319_vm2 = vcmask 1043456   ;;  %s2578_s1 = inlined_call_operand.vmem [shape: f32[288,256], index: 1, kind: input, shape index: {}]   ;;  %s2579_s0 = inlined_call_operand.vmem [shape: f32[16,288], index: 0, kind: input, shape index: {}]   ;;  %s2580_s3 = inlined_call_operand.vmem [shape: f32[1024,128], index: 3, kind: input, shape index: {}]   ;;  %s2581_s2 = inlined_call_operand.vmem [shape: f32[1,256], index: 2, kind: input, shape index: {}]   ;;  %s2582_s5 = inlined_call_operand.vmem [shape: f32[384,128], index: 5, kind: input, shape index: {}]   ;;  %s2583_s4 = inlined_call_operand.vmem [shape: f32[1,128], index: 4, kind: input, shape index: {}]   ;;  %s2584_s7 = inlined_call_operand.vmem [shape: f32[128,128], index: 7, kind: input, shape index: {}]   ;;  %s2585_s6 = inlined_call_operand.vmem [shape: f32[1,128], index: 6, kind: input, shape index: {}]   ;;  %s2586_s8 = inlined_call_operand.vmem [shape: f32[1,128], index: 8, kind: input, shape index: {}]   ;;  %s2587_s9 = inlined_call_operand.vmem [shape: f32[8,128], index: 9, kind: output, shape index: {}]  }
   0x1   :  { %v39_v0 = vld [vmem:[%s2578_s1 + $0x8] sm:$0xff]  ;;  %v41_v1 = vld [vmem:[%s2578_s1 + $0x18] sm:$0xff]  ;;  %v38_v2 = vld [vmem:[%s2578_s1] sm:$0xff]  ;;  %283 = vst [vmem:[#allocation2] sm:$0xff] %v1656_v3  ;;  %vm1658_vm3 = vmmov 0  }
   0x2   :  { %284 = vst [vmem:[#allocation2 + $0x8] sm:$0xff] %v1656_v3  ;;  %289 = vst [vmem:[#allocation2 + $0x30] sm:$0xff] %v1656_v3  ;;  %v1364_v4 = vpack.c.bf16 %v41_v1, %v39_v0  ;;  %v40_v5 = vld [vmem:[%s2578_s1 + $0x10] sm:$0xff]  ;;  %v43_v6 = vld [vmem:[%s2578_s1 + $0x28] sm:$0xff] }
   0x3   :  { %290 = vst [vmem:[#allocation2 + $0x38] sm:$0xff] %v1656_v3  ;;  %775 = vst [vmem:[#allocation3] sm:$0xff] %v1656_v3  ;;  %v45_v7 = vld [vmem:[%s2578_s1 + $0x38] sm:$0xff]  ;;  %v1366_v8 = vpack.c.bf16 %v40_v5, %v38_v2  ;;  %v42_v10 = vld [vmem:[%s2578_s1 + $0x20] sm:$0xff] }
   0x4   :  { %777 = vst [vmem:[#allocation3 + $0x10] sm:$0xff] %v1656_v3  ;;  %v1368_v9 = vpack.c.bf16 %v45_v7, %v43_v6  ;;  %v44_v11 = vld [vmem:[%s2578_s1 + $0x30] sm:$0xff]  ;;  %v47_v12 = vld [vmem:[%s2578_s1 + $0x48] sm:$0xff]  ;;  %1365 = vmatprep.subr.bf16.mxu0 %v1364_v4  ;;  %v49_v13 = vld [vmem:[%s2578_s1 + $0x58] sm:$0xff] }
   0x5   :  { %1367 = vmatpush1.bf16.msra.mxu0 %v1366_v8  ;;  %v1370_v14 = vpack.c.bf16 %v44_v11, %v42_v10  ;;  %v1372_v15 = vpack.c.bf16 %v49_v13, %v47_v12  ;;  %v46_v16 = vld [vmem:[%s2578_s1 + $0x40] sm:$0xff]  ;;  %v48_v17 = vld [vmem:[%s2578_s1 + $0x50] sm:$0xff]  ;;  %v51_v18 = vld [vmem:[%s2578_s1 + $0x68] sm:$0xff] }
   0x6   :  { %1369 = vmatprep.subr.bf16.mxu0 %v1368_v9  ;;  %v53_v19 = vld [vmem:[%s2578_s1 + $0x78] sm:$0xff]  ;;  %v1374_v20 = vpack.c.bf16 %v48_v17, %v46_v16  ;;  %v50_v22 = vld [vmem:[%s2578_s1 + $0x60] sm:$0xff]  ;;  %v52_v23 = vld [vmem:[%s2578_s1 + $0x70] sm:$0xff] }
   0x7   :  { %v1376_v21 = vpack.c.bf16 %v53_v19, %v51_v18  ;;  %v55_v24 = vld [vmem:[%s2578_s1 + $0x88] sm:$0xff]  ;;  %v57_v25 = vld [vmem:[%s2578_s1 + $0x98] sm:$0xff]  ;;  %v1378_v26 = vpack.c.bf16 %v52_v23, %v50_v22  ;;  %v54_v28 = vld [vmem:[%s2578_s1 + $0x80] sm:$0xff] }
   0x8   :  { %v1380_v27 = vpack.c.bf16 %v57_v25, %v55_v24  ;;  %v56_v29 = vld [vmem:[%s2578_s1 + $0x90] sm:$0xff]  ;;  %v59_v30 = vld [vmem:[%s2578_s1 + $0xa8] sm:$0xff]  ;;  %v61_v31 = vld [vmem:[%s2578_s1 + $0xb8] sm:$0xff] }
   0x9   :  { %1371 = vmatpush1.bf16.msra.mxu0 %v1370_v14  ;;  %v1382_v32 = vpack.c.bf16 %v56_v29, %v54_v28  ;;  %v1384_v33 = vpack.c.bf16 %v61_v31, %v59_v30  ;;  %v58_v34 = vld [vmem:[%s2578_s1 + $0xa0] sm:$0xff]  ;;  %v60_v35 = vld [vmem:[%s2578_s1 + $0xb0] sm:$0xff]  ;;  %v63_v36 = vld [vmem:[%s2578_s1 + $0xc8] sm:$0xff] }
   0xa   :  { %1373 = vmatprep.subr.bf16.mxu0 %v1372_v15  ;;  %v65_v37 = vld [vmem:[%s2578_s1 + $0xd8] sm:$0xff]  ;;  %v1386_v38 = vpack.c.bf16 %v60_v35, %v58_v34  ;;  %v62_v40 = vld [vmem:[%s2578_s1 + $0xc0] sm:$0xff]  ;;  %v64_v41 = vld [vmem:[%s2578_s1 + $0xd0] sm:$0xff] }
   0xb   :  { %v1388_v39 = vpack.c.bf16 %v65_v37, %v63_v36  ;;  %v33_v42 = vld [vmem:[%s2579_s0 + $0x8] sm:$0xff]  ;;  %v69_v44 = vld [vmem:[%s2578_s1 + $0xf8] sm:$0xff]  ;;  %v1390_v45 = vpack.c.bf16 %v64_v41, %v62_v40  ;;  %v66_v46 = vld [vmem:[%s2578_s1 + $0xe0] sm:$0xff] }
   0xc   :  { %v67_v43 = vld [vmem:[%s2578_s1 + $0xe8] sm:$0xff]  ;;  %193 = vmatprep.mubr.f32.mxu0 %v33_v42  ;;  %v68_v48 = vld [vmem:[%s2578_s1 + $0xf0] sm:$0xff]  ;;  %v73_v50 = vld [vmem:[%s2578_s1 + $0x118] sm:$0xff] }
   0xd   :  { %1375 = vmatpush1.bf16.msra.mxu0 %v1374_v20  ;;  %v1392_v47 = vpack.c.bf16 %v69_v44, %v67_v43  ;;  %v71_v49 = vld [vmem:[%s2578_s1 + $0x108] sm:$0xff]  ;;  %v342_v51 = vld [vmem:[%s2580_s3 + $0x80] sm:$0xff]  ;;  %v344_v56 = vld [vmem:[%s2580_s3 + $0x90] sm:$0xff]  ;;  %v1394_v58 = vpack.c.bf16 %v68_v48, %v66_v46 }
   0xe   :  { %1377 = vmatprep.subr.bf16.mxu0 %v1376_v21  ;;  %v343_v52 = vld [vmem:[%s2580_s3 + $0x88] sm:$0xff]  ;;  %v326_v53 = vld [vmem:[%s2580_s3] sm:$0xff]  ;;  %v345_v57 = vld [vmem:[%s2580_s3 + $0x98] sm:$0xff]  ;;  %v1396_v0 = vpack.c.bf16 %v73_v50, %v71_v49 }
   0xf   :  { %v1436_v54 = vpack.c.bf16 %v343_v52, %v342_v51  ;;  %v327_v55 = vld [vmem:[%s2580_s3 + $0x8] sm:$0xff]  ;;  %v1440_v60 = vpack.c.bf16 %v345_v57, %v344_v56  ;;  %v328_v61 = vld [vmem:[%s2580_s3 + $0x10] sm:$0xff]  ;;  %v329_v62 = vld [vmem:[%s2580_s3 + $0x18] sm:$0xff] }
  0x10   :  { %v1438_v59 = vpack.c.bf16 %v327_v55, %v326_v53  ;;  %v346_v63 = vld [vmem:[%s2580_s3 + $0xa0] sm:$0xff]  ;;  %v72_v2 = vld [vmem:[%s2578_s1 + $0x110] sm:$0xff]  ;;  %v347_v4 = vld [vmem:[%s2580_s3 + $0xa8] sm:$0xff]  ;;  %v1442_v7 = vpack.c.bf16 %v329_v62, %v328_v61 }
  0x11   :  { %1379 = vmatpush1.bf16.msra.mxu0 %v1378_v26  ;;  %v70_v1 = vld [vmem:[%s2578_s1 + $0x100] sm:$0xff]  ;;  %1437 = vmatprep.subr.bf16.mxu1 %v1436_v54  ;;  %v75_v5 = vld [vmem:[%s2578_s1 + $0x128] sm:$0xff]  ;;  %v77_v6 = vld [vmem:[%s2578_s1 + $0x138] sm:$0xff]  ;;  %v1444_v8 = vpack.c.bf16 %v347_v4, %v346_v63 }
  0x12   :  { %1381 = vmatprep.subr.bf16.mxu0 %v1380_v27  ;;  %1439 = vmatpush3.bf16.msra.mxu1 %v1438_v59  ;;  %v330_v9 = vld [vmem:[%s2580_s3 + $0x20] sm:$0xff]  ;;  %v331_v10 = vld [vmem:[%s2580_s3 + $0x28] sm:$0xff]  ;;  %v1398_v11 = vpack.c.bf16 %v72_v2, %v70_v1  ;;  %v348_v12 = vld [vmem:[%s2580_s3 + $0xb0] sm:$0xff]  ;;  %v1400_v14 = vpack.c.bf16 %v77_v6, %v75_v5 }
  0x13   :  { %1441 = vmatprep.subr.bf16.mxu1 %v1440_v60  ;;  %v349_v13 = vld [vmem:[%s2580_s3 + $0xb8] sm:$0xff]  ;;  %v74_v15 = vld [vmem:[%s2578_s1 + $0x120] sm:$0xff]  ;;  %v76_v16 = vld [vmem:[%s2578_s1 + $0x130] sm:$0xff]  ;;  %v1446_v19 = vpack.c.bf16 %v331_v10, %v330_v9 }
  0x14   :  { %v79_v17 = vld [vmem:[%s2578_s1 + $0x148] sm:$0xff]  ;;  %v81_v18 = vld [vmem:[%s2578_s1 + $0x158] sm:$0xff]  ;;  %v1448_v20 = vpack.c.bf16 %v349_v13, %v348_v12  ;;  %v332_v21 = vld [vmem:[%s2580_s3 + $0x30] sm:$0xff]  ;;  %v1402_v23 = vpack.c.bf16 %v76_v16, %v74_v15 }
  0x15   :  { %1383 = vmatpush1.bf16.msra.mxu0 %v1382_v32  ;;  %v333_v22 = vld [vmem:[%s2580_s3 + $0x38] sm:$0xff]  ;;  %v350_v24 = vld [vmem:[%s2580_s3 + $0xc0] sm:$0xff]  ;;  %v351_v25 = vld [vmem:[%s2580_s3 + $0xc8] sm:$0xff]  ;;  %v1404_v26 = vpack.c.bf16 %v81_v18, %v79_v17 }
  0x16   :  { %1385 = vmatprep.subr.bf16.mxu0 %v1384_v33  ;;  %1443 = vmatpush3.bf16.msra.mxu1 %v1442_v7  ;;  %v78_v27 = vld [vmem:[%s2578_s1 + $0x140] sm:$0xff]  ;;  %v80_v28 = vld [vmem:[%s2578_s1 + $0x150] sm:$0xff]  ;;  %v83_v29 = vld [vmem:[%s2578_s1 + $0x168] sm:$0xff]  ;;  %v1450_v31 = vpack.c.bf16 %v333_v22, %v332_v21  ;;  %v1452_v32 = vpack.c.bf16 %v351_v25, %v350_v24 }
  0x17   :  { %1445 = vmatprep.subr.bf16.mxu1 %v1444_v8  ;;  %v85_v30 = vld [vmem:[%s2578_s1 + $0x178] sm:$0xff]  ;;  %v1406_v33 = vpack.c.bf16 %v80_v28, %v78_v27  ;;  %v82_v35 = vld [vmem:[%s2578_s1 + $0x160] sm:$0xff]  ;;  %v84_v36 = vld [vmem:[%s2578_s1 + $0x170] sm:$0xff] }
  0x18   :  { %v1408_v34 = vpack.c.bf16 %v85_v30, %v83_v29  ;;  %v87_v37 = vld [vmem:[%s2578_s1 + $0x188] sm:$0xff]  ;;  %v86_v41 = vld [vmem:[%s2578_s1 + $0x180] sm:$0xff]  ;;  %v88_v42 = vld [vmem:[%s2578_s1 + $0x190] sm:$0xff] }
  0x19   :  { %1387 = vmatpush1.bf16.msra.mxu0 %v1386_v38  ;;  %v89_v38 = vld [vmem:[%s2578_s1 + $0x198] sm:$0xff]  ;;  %v91_v43 = vld [vmem:[%s2578_s1 + $0x1a8] sm:$0xff]  ;;  %v92_v48 = vld [vmem:[%s2578_s1 + $0x1b0] sm:$0xff] }
  0x1a   :  { %1389 = vmatprep.subr.bf16.mxu0 %v1388_v39  ;;  %1447 = vmatpush3.bf16.msra.mxu1 %v1446_v19  ;;  %v1410_v39 = vpack.c.bf16 %v84_v36, %v82_v35  ;;  %v1412_v40 = vpack.c.bf16 %v89_v38, %v87_v37  ;;  %v93_v44 = vld [vmem:[%s2578_s1 + $0x1b8] sm:$0xff]  ;;  %v95_v49 = vld [vmem:[%s2578_s1 + $0x1c8] sm:$0xff]  ;;  %v94_v53 = vld [vmem:[%s2578_s1 + $0x1c0] sm:$0xff] }
  0x1b   :  { %1449 = vmatprep.subr.bf16.mxu1 %v1448_v20  ;;  %v1416_v46 = vpack.c.bf16 %v93_v44, %v91_v43  ;;  %v97_v50 = vld [vmem:[%s2578_s1 + $0x1d8] sm:$0xff]  ;;  %v96_v54 = vld [vmem:[%s2578_s1 + $0x1d0] sm:$0xff]  ;;  %v99_v55 = vld [vmem:[%s2578_s1 + $0x1e8] sm:$0xff] }
  0x1c   :  { %v1420_v52 = vpack.c.bf16 %v97_v50, %v95_v49  ;;  %v101_v56 = vld [vmem:[%s2578_s1 + $0x1f8] sm:$0xff]  ;;  %v1422_v57 = vpack.c.bf16 %v96_v54, %v94_v53  ;;  %v98_v59 = vld [vmem:[%s2578_s1 + $0x1e0] sm:$0xff]  ;;  %v100_v60 = vld [vmem:[%s2578_s1 + $0x1f0] sm:$0xff] }
  0x1d   :  { %1391 = vmatpush1.bf16.msra.mxu0 %v1390_v45  ;;  %v1414_v45 = vpack.c.bf16 %v88_v42, %v86_v41  ;;  %v103_v61 = vld [vmem:[%s2578_s1 + $0x208] sm:$0xff]  ;;  %v105_v62 = vld [vmem:[%s2578_s1 + $0x218] sm:$0xff]  ;;  %v1426_v63 = vpack.c.bf16 %v100_v60, %v98_v59  ;;  %v102_v1 = vld [vmem:[%s2578_s1 + $0x200] sm:$0xff] }
  0x1e   :  { %1393 = vmatprep.subr.bf16.mxu0 %v1392_v47  ;;  %1451 = vmatpush3.bf16.msra.mxu1 %v1450_v31  ;;  %v90_v47 = vld [vmem:[%s2578_s1 + $0x1a0] sm:$0xff]  ;;  %v104_v2 = vld [vmem:[%s2578_s1 + $0x210] sm:$0xff]  ;;  %v107_v4 = vld [vmem:[%s2578_s1 + $0x228] sm:$0xff] }
  0x1f   :  { %1453 = vmatprep.subr.bf16.mxu1 %v1452_v32  ;;  %v1418_v51 = vpack.c.bf16 %v92_v48, %v90_v47  ;;  %v109_v5 = vld [vmem:[%s2578_s1 + $0x238] sm:$0xff]  ;;  %v32_v6 = vld [vmem:[%s2579_s0] sm:$0xff]  ;;  %v1430_v7 = vpack.c.bf16 %v104_v2, %v102_v1  ;;  %v439_v13 = vld [vmem:[%s2580_s3 + $0x388] sm:$0xff] }
  0x20   :  { %v36_v8 = vld [vmem:[%s2579_s0 + $0x20] sm:$0xff]  ;;  %v1432_v9 = vpack.c.bf16 %v109_v5, %v107_v4  ;;  %v423_v18 = vld [vmem:[%s2580_s3 + $0x308] sm:$0xff]  ;;  %v440_v19 = vld [vmem:[%s2580_s3 + $0x390] sm:$0xff] }
  0x21   :  { %1395 = vmatpush1.bf16.msra.mxu0 %v1394_v58  ;;  %v1424_v58 = vpack.c.bf16 %v101_v56, %v99_v55  ;;  %v106_v10 = vld [vmem:[%s2578_s1 + $0x220] sm:$0xff]  ;;  %v441_v20 = vld [vmem:[%s2580_s3 + $0x398] sm:$0xff]  ;;  %v34_v21 = vld [vmem:[%s2579_s0 + $0x10] sm:$0xff] }
  0x22   :  { %1397 = vmatprep.subr.bf16.mxu0 %v1396_v0  ;;  %v1428_v0 = vpack.c.bf16 %v105_v62, %v103_v61  ;;  %v438_v12 = vld [vmem:[%s2580_s3 + $0x380] sm:$0xff]  ;;  %v424_v24 = vld [vmem:[%s2580_s3 + $0x310] sm:$0xff]  ;;  %v425_v25 = vld [vmem:[%s2580_s3 + $0x318] sm:$0xff] }
  0x23   :  { %v1532_v16 = vpack.c.bf16 %v439_v13, %v438_v12  ;;  %v422_v17 = vld [vmem:[%s2580_s3 + $0x300] sm:$0xff]  ;;  %v443_v27 = vld [vmem:[%s2580_s3 + $0x3a8] sm:$0xff]  ;;  %v1538_v29 = vpack.c.bf16 %v425_v25, %v424_v24  ;;  %v352_v36 = vld [vmem:[%s2580_s3 + $0xd0] sm:$0xff]  ;;  %v112_v24 = vlaneseq }
  0x24   :  { %v1534_v22 = vpack.c.bf16 %v423_v18, %v422_v17  ;;  %v37_v28 = vld [vmem:[%s2579_s0 + $0x28] sm:$0xff]  ;;  %v334_v31 = vld [vmem:[%s2580_s3 + $0x40] sm:$0xff]  ;;  %v353_v37 = vld [vmem:[%s2580_s3 + $0xd8] sm:$0xff] }
  0x25   :  { %1399 = vmatpush1.bf16.msra.mxu0 %v1398_v11  ;;  %v108_v11 = vld [vmem:[%s2578_s1 + $0x230] sm:$0xff]  ;;  %v335_v32 = vld [vmem:[%s2580_s3 + $0x48] sm:$0xff]  ;;  %v337_v42 = vld [vmem:[%s2580_s3 + $0x58] sm:$0xff]  ;;  %v113_v25 = vshrl.u32 %v112_v24, 7 }
  0x26   :  { %1401 = vmatprep.subr.bf16.mxu0 %v1400_v14  ;;  %v35_v14 = vld [vmem:[%s2579_s0 + $0x18] sm:$0xff]  ;;  %v1434_v15 = vpack.c.bf16 %v108_v11, %v106_v10  ;;  %v444_v38 = vld [vmem:[%s2580_s3 + $0x3b0] sm:$0xff]  ;;  %v354_v48 = vld [vmem:[%s2580_s3 + $0xe0] sm:$0xff] }
  0x27   :  { %v336_v41 = vld [vmem:[%s2580_s3 + $0x50] sm:$0xff]  ;;  %v355_v49 = vld [vmem:[%s2580_s3 + $0xe8] sm:$0xff]  ;;  %v446_v50 = vld [vmem:[%s2580_s3 + $0x3c0] sm:$0xff] }
  0x28   :  { %v1458_v44 = vpack.c.bf16 %v337_v42, %v336_v41  ;;  %v338_v53 = vld [vmem:[%s2580_s3 + $0x60] sm:$0xff]  ;;  %v339_v54 = vld [vmem:[%s2580_s3 + $0x68] sm:$0xff]  ;;  %v356_v60 = vld [vmem:[%s2580_s3 + $0xf0] sm:$0xff] }
  0x29   :  { %1403 = vmatpush1.bf16.msra.mxu0 %v1402_v23  ;;  %v1536_v23 = vpack.c.bf16 %v441_v20, %v440_v19  ;;  %v1462_v56 = vpack.c.bf16 %v339_v54, %v338_v53  ;;  %v357_v61 = vld [vmem:[%s2580_s3 + $0xf8] sm:$0xff]  ;;  %v448_v62 = vld [vmem:[%s2580_s3 + $0x3d0] sm:$0xff]  ;;  %v375_v10 = vld [vmem:[%s2580_s3 + $0x188] sm:$0xff] }
  0x2a   :  { %1405 = vmatprep.subr.bf16.mxu0 %v1404_v26  ;;  %v442_v26 = vld [vmem:[%s2580_s3 + $0x3a0] sm:$0xff]  ;;  %v340_v1 = vld [vmem:[%s2580_s3 + $0x70] sm:$0xff]  ;;  %v341_v2 = vld [vmem:[%s2580_s3 + $0x78] sm:$0xff] }
  0x2b   :  { %v1540_v30 = vpack.c.bf16 %v443_v27, %v442_v26  ;;  %v1466_v5 = vpack.c.bf16 %v341_v2, %v340_v1  ;;  %v450_v11 = vld [vmem:[%s2580_s3 + $0x3e0] sm:$0xff]  ;;  %v451_v13 = vld [vmem:[%s2580_s3 + $0x3e8] sm:$0xff]  ;;  %v452_v18 = vld [vmem:[%s2580_s3 + $0x3f0] sm:$0xff]  ;;  %v114_v26 = vsub.s32 0, %v113_v25 }
  0x2c   :  { %v453_v19 = vld [vmem:[%s2580_s3 + $0x3f8] sm:$0xff]  ;;  %v110_v27 = vld [vmem:[%s2581_s2] sm:$0x3]  ;;  %v359_v42 = vld [vmem:[%s2580_s3 + $0x108] sm:$0xff] }
  0x2d   :  { %1407 = vmatpush1.bf16.msra.mxu0 %v1406_v33  ;;  %v1454_v33 = vpack.c.bf16 %v335_v32, %v334_v31  ;;  %v1560_v20 = vpack.c.bf16 %v453_v19, %v452_v18  ;;  %v358_v41 = vld [vmem:[%s2580_s3 + $0x100] sm:$0xff]  ;;  %v360_v53 = vld [vmem:[%s2580_s3 + $0x110] sm:$0xff]  ;;  %v361_v54 = vld [vmem:[%s2580_s3 + $0x118] sm:$0xff] }
  0x2e   :  { %1409 = vmatprep.subr.bf16.mxu0 %v1408_v34  ;;  %v427_v34 = vld [vmem:[%s2580_s3 + $0x328] sm:$0xff]  ;;  %v1474_v2 = vpack.c.bf16 %v361_v54, %v360_v53  ;;  %v364_v19 = vld [vmem:[%s2580_s3 + $0x130] sm:$0xff]  ;;  %v409_v54 = vld [vmem:[%s2580_s3 + $0x298] sm:$0xff] }
  0x2f   :  { %1455 = vmatpush3.bf16.msra.mxu1 %v1454_v33  ;;  %v408_v53 = vld [vmem:[%s2580_s3 + $0x290] sm:$0xff] }
  0x31   :  { %1411 = vmatpush1.bf16.msra.mxu0 %v1410_v39  ;;  %v1456_v39 = vpack.c.bf16 %v353_v37, %v352_v36 }
  0x32   :  { %1413 = vmatprep.subr.bf16.mxu0 %v1412_v40  ;;  %v445_v40 = vld [vmem:[%s2580_s3 + $0x3b8] sm:$0xff] }
  0x33   :  { %v1544_v43 = vpack.c.bf16 %v445_v40, %v444_v38  ;;  %1457 = vmatprep.subr.bf16.mxu1 %v1456_v39  ;;  %v296_v38 = vld [vmem:[#allocation2 + $0x8] sm:$0xc0]  ;;  %v295_v39 = vld [vmem:[#allocation2] sm:$0xc0] }
  0x34   :  { %1459 = vmatpush3.bf16.msra.mxu1 %v1458_v44  ;;  %v469_v40 = vrot.slane %v296_v38, 6  ;;  %v306_v44 = vld [vmem:[#allocation2 + $0x38] sm:$0x3] }
  0x35   :  { %1415 = vmatpush1.bf16.msra.mxu0 %v1414_v45  ;;  %v428_v45 = vld [vmem:[%s2580_s3 + $0x330] sm:$0xff] }
  0x36   :  { %1417 = vmatprep.subr.bf16.mxu0 %v1416_v46  ;;  %v429_v46 = vld [vmem:[%s2580_s3 + $0x338] sm:$0xff] }
  0x37   :  { %v1546_v47 = vpack.c.bf16 %v429_v46, %v428_v45  ;;  %v305_v45 = vld [vmem:[#allocation2 + $0x30] sm:$0x3] }
  0x39   :  { %1419 = vmatpush1.bf16.msra.mxu0 %v1418_v51  ;;  %v1460_v51 = vpack.c.bf16 %v355_v49, %v354_v48  ;;  %v376_v49 = vld [vmem:[%s2580_s3 + $0x190] sm:$0xff] }
  0x3a   :  { %1421 = vmatprep.subr.bf16.mxu0 %v1420_v52  ;;  %v447_v52 = vld [vmem:[%s2580_s3 + $0x3c8] sm:$0xff] }
  0x3b   :  { %v1548_v55 = vpack.c.bf16 %v447_v52, %v446_v50  ;;  %1461 = vmatprep.subr.bf16.mxu1 %v1460_v51  ;;  %v377_v50 = vld [vmem:[%s2580_s3 + $0x198] sm:$0xff]  ;;  %v1470_v52 = vpack.c.bf16 %v359_v42, %v358_v41  ;;  %v388_v41 = vld [vmem:[%s2580_s3 + $0x1f0] sm:$0xff] }
  0x3c   :  { %1463 = vmatpush3.bf16.msra.mxu1 %v1462_v56  ;;  %v389_v42 = vld [vmem:[%s2580_s3 + $0x1f8] sm:$0xff] }
  0x3d   :  { %1423 = vmatpush1.bf16.msra.mxu0 %v1422_v57  ;;  %v430_v57 = vld [vmem:[%s2580_s3 + $0x340] sm:$0xff] }
  0x3e   :  { %1425 = vmatprep.subr.bf16.mxu0 %v1424_v58  ;;  %v431_v58 = vld [vmem:[%s2580_s3 + $0x348] sm:$0xff] }
  0x3f   :  { %v1550_v59 = vpack.c.bf16 %v431_v58, %v430_v57  ;;  %v1472_v57 = vpack.c.bf16 %v377_v50, %v376_v49  ;;  %v324_v58 = vrot.slane %v306_v44, 4  ;;  %v1496_v44 = vpack.c.bf16 %v389_v42, %v388_v41  ;;  %v800_v42 = vld [vmem:[%s2582_s5 + $0x90] sm:$0xff] }
  0x41   :  { %1427 = vmatpush1.bf16.msra.mxu0 %v1426_v63  ;;  %v1464_v63 = vpack.c.bf16 %v357_v61, %v356_v60  ;;  %v379_v60 = vld [vmem:[%s2580_s3 + $0x1a8] sm:$0xff] }
  0x42   :  { %1429 = vmatprep.subr.bf16.mxu0 %v1428_v0  ;;  %v449_v0 = vld [vmem:[%s2580_s3 + $0x3d8] sm:$0xff] }
  0x43   :  { %v1552_v4 = vpack.c.bf16 %v449_v0, %v448_v62  ;;  %1465 = vmatprep.subr.bf16.mxu1 %v1464_v63 }
  0x44   :  { %194 = vmatmul.mubr.f32.vlgmr.msra.gmra.mrb[0].mxu0 %v32_v6  ;;  %v432_v6 = vld [vmem:[%s2580_s3 + $0x350] sm:$0xff]  ;;  %1467 = vmatpush3.bf16.msra.mxu1 %v1466_v5 }
  0x45   :  { %1431 = vmatpush1.bf16.msra.mxu0 %v1430_v7  ;;  %199 = vmatprep.mubr.f32.mxu0 %v36_v8  ;;  %v433_v7 = vld [vmem:[%s2580_s3 + $0x358] sm:$0xff] }
  0x46   :  { %1433 = vmatprep.subr.bf16.mxu0 %v1432_v9  ;;  %v1554_v8 = vpack.c.bf16 %v433_v7, %v432_v6  ;;  %v374_v9 = vld [vmem:[%s2580_s3 + $0x180] sm:$0xff] }
  0x47   :  { %v1468_v12 = vpack.c.bf16 %v375_v10, %v374_v9  ;;  %v362_v10 = vld [vmem:[%s2580_s3 + $0x120] sm:$0xff] }
  0x48   :  { %200 = vmatmul.mubr.f32.gmra.mrb[2].mxu0 %v35_v14  ;;  %v1556_v14 = vpack.c.bf16 %v451_v13, %v450_v11  ;;  %v363_v11 = vld [vmem:[%s2580_s3 + $0x128] sm:$0xff]  ;;  %v380_v13 = vld [vmem:[%s2580_s3 + $0x1b0] sm:$0xff] }
  0x49   :  { %1435 = vmatpush1.bf16.msra.mxu0 %v1434_v15  ;;  %270 = vmatprep.mubr.f32.mxu0 %v1656_v3  ;;  %v434_v15 = vld [vmem:[%s2580_s3 + $0x360] sm:$0xff] }
  0x4a   :  { %1533 = vmatprep.subr.bf16.mxu0 %v1532_v16  ;;  %v435_v16 = vld [vmem:[%s2580_s3 + $0x368] sm:$0xff]  ;;  %1469 = vmatprep.subr.bf16.mxu1 %v1468_v12 }
  0x4b   :  { %v1558_v17 = vpack.c.bf16 %v435_v16, %v434_v15  ;;  %v1478_v16 = vpack.c.bf16 %v363_v11, %v362_v10  ;;  %v398_v10 = vld [vmem:[%s2580_s3 + $0x240] sm:$0xff]  ;;  %v399_v11 = vld [vmem:[%s2580_s3 + $0x248] sm:$0xff] }
  0x4c   :  { %1076 = vmatmul.mubr.msk.f32.vlgmr.msra.gmra.mrb[0].mxu0 %vm122_vm0, %v34_v21  ;;  %v436_v21 = vld [vmem:[%s2580_s3 + $0x370] sm:$0xff] }
  0x4d   :  { %276 = vmatprep.mubr.f32.mxu0 %v1656_v3  ;;  %1535 = vmatpush3.bf16.msra.mxu0 %v1534_v22  ;;  %v426_v3 = vld [vmem:[%s2580_s3 + $0x320] sm:$0xff]  ;;  %v437_v22 = vld [vmem:[%s2580_s3 + $0x378] sm:$0xff] }
  0x4e   :  { %1537 = vmatprep.subr.bf16.mxu0 %v1536_v23  ;;  %v1542_v35 = vpack.c.bf16 %v427_v34, %v426_v3  ;;  %v1562_v23 = vpack.c.bf16 %v437_v22, %v436_v21  ;;  %v382_v21 = vld [vmem:[%s2580_s3 + $0x1c0] sm:$0xff]  ;;  %v383_v22 = vld [vmem:[%s2580_s3 + $0x1c8] sm:$0xff] }
  0x4f   :  { %v1484_v24 = vpack.c.bf16 %v383_v22, %v382_v21  ;;  %v402_v22 = vld [vmem:[%s2580_s3 + $0x260] sm:$0xff] }
  0x50   :  { %1077 = vmatmul.mubr.msk.f32.gmra.mrb[2].mxu0 %vm122_vm0, %v37_v28  ;;  %v118_v28 = vsub.s32 1, %v113_v25  ;;  %v366_v25 = vld [vmem:[%s2580_s3 + $0x140] sm:$0xff] }
  0x51   :  { %1539 = vmatpush3.bf16.msra.mxu0 %v1538_v29  ;;  %v115_v29 = vrot.slane %v110_v27, %v114_v26  ;;  %v367_v26 = vld [vmem:[%s2580_s3 + $0x148] sm:$0xff] }
  0x52   :  { %1541 = vmatprep.subr.bf16.mxu0 %v1540_v30  ;;  %v119_v30 = vrot.slane %v110_v27, %v118_v28  ;;  %v384_v27 = vld [vmem:[%s2580_s3 + $0x1d0] sm:$0xff]  ;;  %v385_v28 = vld [vmem:[%s2580_s3 + $0x1d8] sm:$0xff] }
  0x55   :  { %1543 = vmatpush3.bf16.msra.mxu0 %v1542_v35 }
  0x56   :  { %1545 = vmatprep.subr.bf16.mxu0 %v1544_v43 }
  0x59   :  { %1547 = vmatpush3.bf16.msra.mxu0 %v1546_v47  ;;  %v466_v47 = vrot.slane %v295_v39, 6  ;;  %v370_v39 = vld [vmem:[%s2580_s3 + $0x160] sm:$0xff] }
  0x5a   :  { %1549 = vmatprep.subr.bf16.mxu0 %v1548_v55  ;;  %v322_v55 = vrot.slane %v305_v45, 4  ;;  %v372_v45 = vld [vmem:[%s2580_s3 + $0x170] sm:$0xff] }
  0x5d   :  { %1551 = vmatpush3.bf16.msra.mxu0 %v1550_v59  ;;  %v378_v59 = vld [vmem:[%s2580_s3 + $0x1a0] sm:$0xff] }
  0x5e   :  { %1553 = vmatprep.subr.bf16.mxu0 %v1552_v4  ;;  %v1476_v4 = vpack.c.bf16 %v379_v60, %v378_v59  ;;  %v410_v59 = vld [vmem:[%s2580_s3 + $0x2a0] sm:$0xff]  ;;  %v411_v60 = vld [vmem:[%s2580_s3 + $0x2a8] sm:$0xff] }
  0x61   :  { %1555 = vmatpush3.bf16.msra.mxu0 %v1554_v8 }
  0x62   :  { %1557 = vmatprep.subr.bf16.mxu0 %v1556_v14  ;;  %v381_v14 = vld [vmem:[%s2580_s3 + $0x1b8] sm:$0xff] }
  0x63   :  { %v1480_v18 = vpack.c.bf16 %v381_v14, %v380_v13  ;;  %v417_v13 = vld [vmem:[%s2580_s3 + $0x2d8] sm:$0xff]  ;;  %v1518_v14 = vpack.c.bf16 %v399_v11, %v398_v10  ;;  %v791_v11 = vld [vmem:[%s2582_s5 + $0x48] sm:$0xff] }
  0x65   :  { %1559 = vmatpush3.bf16.msra.mxu0 %v1558_v17 }
  0x66   :  { %1561 = vmatprep.subr.bf16.mxu0 %v1560_v20  ;;  %v365_v20 = vld [vmem:[%s2580_s3 + $0x138] sm:$0xff] }
  0x69   :  { %1563 = vmatpush3.bf16.msra.mxu0 %v1562_v23  ;;  %v1482_v23 = vpack.c.bf16 %v365_v20, %v364_v19  ;;  %v419_v19 = vld [vmem:[%s2580_s3 + $0x2e8] sm:$0xff] }
 0x11f   :  { %v272_v31 = vpop.f32.mrb[0].mxu0 }
 0x120   :  { %v2152_v32 = vadd.f32 %v272_v31, %v115_v29  ;;  %v274_v3 = vpop.f32.mrb[1].mxu0  ;;  %v368_v31 = vld [vmem:[%s2580_s3 + $0x150] sm:$0xff] }
 0x121   :  { %v1645_v33 = vadd.f32 %v274_v3, %v119_v30  ;;  %v369_v3 = vld [vmem:[%s2580_s3 + $0x158] sm:$0xff] }
 0x122   :  { %291 = vst [vmem:[#allocation2 + $0x10] sm:$0xff] %v2152_v32 }
 0x123   :  { %292 = vst [vmem:[#allocation2 + $0x18] sm:$0xff] %v1645_v33  ;;  %v278_v34 = vpop.f32.mrb[2].mxu0 }
 0x124   :  { %v2155_v35 = vadd.f32 %v278_v34, %v115_v29  ;;  %v280_v36 = vpop.f32.mrb[3].mxu0  ;;  %v1486_v29 = vpack.c.bf16 %v367_v26, %v366_v25  ;;  %v387_v34 = vld [vmem:[%s2580_s3 + $0x1e8] sm:$0xff]  ;;  %v421_v25 = vld [vmem:[%s2580_s3 + $0x2f8] sm:$0xff] }
 0x125   :  { %v2157_v37 = vadd.f32 %v280_v36, %v119_v30  ;;  %v1488_v30 = vpack.c.bf16 %v385_v28, %v384_v27  ;;  %v1490_v36 = vpack.c.bf16 %v369_v3, %v368_v31  ;;  %v404_v28 = vld [vmem:[%s2580_s3 + $0x270] sm:$0xff]  ;;  %v1657_v31 = vmov 0.0|0.0   ;;  %v798_v3 = vld [vmem:[%s2582_s5 + $0x80] sm:$0xff] }
 0x126   :  { %293 = vst [vmem:[#allocation2 + $0x20] sm:$0xff] %v2155_v35  ;;  %1596 = vmatprep.subr.bf16.mxu0 %v1657_v31 }
 0x127   :  { %294 = vst [vmem:[#allocation2 + $0x28] sm:$0xff] %v2157_v37 }
 0x129   :  { %v297_v43 = vld [vmem:[#allocation2 + $0x10] sm:$0x3f] }
 0x12a   :  { %v298_v46 = vld [vmem:[#allocation2 + $0x18] sm:$0x3f]  ;;  %v467_v48 = vrot.slane %v297_v43, 6 }
 0x12b   :  { %v470_v51 = vrot.slane %v298_v46, 6  ;;  %v373_v46 = vld [vmem:[%s2580_s3 + $0x178] sm:$0xff] }
 0x12c   :  { %v468_v62 = vsel %vm465_vm1, %v466_v47, %v467_v48  ;;  %v406_v47 = vld [vmem:[%s2580_s3 + $0x280] sm:$0xff]  ;;  %v407_v48 = vld [vmem:[%s2580_s3 + $0x288] sm:$0xff]  ;;  %v1498_v49 = vpack.c.bf16 %v373_v46, %v372_v45  ;;  %v817_v46 = vld [vmem:[%s2582_s5 + $0x118] sm:$0xff] }
 0x12d   :  { %v471_v56 = vsel %vm465_vm1, %v469_v40, %v470_v51  ;;  %v303_v61 = vld [vmem:[#allocation2 + $0x20] sm:$0xfc]  ;;  %v371_v40 = vld [vmem:[%s2580_s3 + $0x168] sm:$0xff]  ;;  %v1500_v50 = vpack.c.bf16 %v407_v48, %v406_v47  ;;  %v784_v47 = vld [vmem:[%s2582_s5 + $0x10] sm:$0xff] }
 0x12e   :  { %558 = vmatprep.mubr.f32.mxu1 %v471_v56  ;;  %v304_v63 = vld [vmem:[#allocation2 + $0x28] sm:$0xfc]  ;;  %v320_v0 = vrot.slane %v303_v61, 4  ;;  %v1494_v43 = vpack.c.bf16 %v371_v40, %v370_v39  ;;  %v390_v51 = vld [vmem:[%s2580_s3 + $0x200] sm:$0xff]  ;;  %v1504_v56 = vpack.c.bf16 %v409_v54, %v408_v53  ;;  %v785_v48 = vld [vmem:[%s2582_s5 + $0x18] sm:$0xff] }
 0x12f   :  { %559 = vmatmul.mubr.f32.vlgmr.msra.gmra.mrb[0].mxu1 %v468_v62  ;;  %v321_v1 = vrot.slane %v304_v63, 4  ;;  %v1508_v62 = vpack.c.bf16 %v411_v60, %v410_v59  ;;  %v394_v63 = vld [vmem:[%s2580_s3 + $0x220] sm:$0xff]  ;;  %v783_v39 = vld [vmem:[%s2582_s5 + $0x8] sm:$0xff]  ;;  %v805_v59 = vld [vmem:[%s2582_s5 + $0xb8] sm:$0xff] }
 0x130   :  { %1471 = vmatpush3.bf16.msra.mxu1 %v1470_v52  ;;  %628 = vmatprep.mubr.f32.mxu1 %v1645_v33  ;;  %v323_v5 = vsel %vm319_vm2, %v320_v0, %v322_v55  ;;  %v480_v8 = vrot.slane %v320_v0, 6  ;;  %v386_v33 = vld [vmem:[%s2580_s3 + $0x1e0] sm:$0xff]  ;;  %v391_v52 = vld [vmem:[%s2580_s3 + $0x208] sm:$0xff] }
 0x131   :  { %1473 = vmatprep.subr.bf16.mxu1 %v1472_v57  ;;  %v325_v6 = vsel %vm319_vm2, %v321_v1, %v324_v58  ;;  %v483_v7 = vrot.slane %v321_v1, 6  ;;  %v481_v9 = vrot.slane %v323_v5, 6  ;;  %v1492_v38 = vpack.c.bf16 %v387_v34, %v386_v33  ;;  %v392_v57 = vld [vmem:[%s2580_s3 + $0x210] sm:$0xff]  ;;  %v393_v58 = vld [vmem:[%s2580_s3 + $0x218] sm:$0xff]  ;;  %v395_v0 = vld [vmem:[%s2580_s3 + $0x228] sm:$0xff] }
 0x132   :  { %v484_v12 = vrot.slane %v325_v6, 6  ;;  %v1502_v55 = vpack.c.bf16 %v391_v52, %v390_v51  ;;  %v1506_v61 = vpack.c.bf16 %v393_v58, %v392_v57  ;;  %v412_v1 = vld [vmem:[%s2580_s3 + $0x2b0] sm:$0xff]  ;;  %v397_v5 = vld [vmem:[%s2580_s3 + $0x238] sm:$0xff]  ;;  %v414_v6 = vld [vmem:[%s2580_s3 + $0x2c0] sm:$0xff] }
 0x133   :  { %v482_v17 = vsel %vm465_vm1, %v480_v8, %v481_v9  ;;  %v799_v33 = vld [vmem:[%s2582_s5 + $0x88] sm:$0xff]  ;;  %v814_v34 = vld [vmem:[%s2582_s5 + $0x100] sm:$0xff]  ;;  %v804_v58 = vld [vmem:[%s2582_s5 + $0xb0] sm:$0xff] }
 0x134   :  { %1475 = vmatpush3.bf16.msra.mxu1 %v1474_v2  ;;  %v485_v15 = vsel %vm465_vm1, %v483_v7, %v484_v12  ;;  %v415_v7 = vld [vmem:[%s2580_s3 + $0x2c8] sm:$0xff]  ;;  %v416_v12 = vld [vmem:[%s2580_s3 + $0x2d0] sm:$0xff]  ;;  %v802_v51 = vld [vmem:[%s2582_s5 + $0xa0] sm:$0xff] }
 0x135   :  { %768 = vmatprep.mubr.f32.mxu0 %v485_v15  ;;  %1477 = vmatprep.subr.bf16.mxu1 %v1476_v4  ;;  %v396_v4 = vld [vmem:[%s2580_s3 + $0x230] sm:$0xff]  ;;  %v1516_v9 = vpack.c.bf16 %v415_v7, %v414_v6  ;;  %v1520_v15 = vpack.c.bf16 %v417_v13, %v416_v12  ;;  %v803_v52 = vld [vmem:[%s2582_s5 + $0xa8] sm:$0xff]  ;;  %v818_v53 = vld [vmem:[%s2582_s5 + $0x120] sm:$0xff] }
 0x136   :  { %769 = vmatmul.mubr.f32.vlgmr.msra.gmra.mrb[4].mxu0 %v482_v17  ;;  %v1514_v8 = vpack.c.bf16 %v397_v5, %v396_v4  ;;  %v401_v17 = vld [vmem:[%s2580_s3 + $0x258] sm:$0xff]  ;;  %v1572_v54 = vpack.c.bf16 %v803_v52, %v802_v51  ;;  %v787_v57 = vld [vmem:[%s2582_s5 + $0x28] sm:$0xff]  ;;  %v806_v4 = vld [vmem:[%s2582_s5 + $0xc0] sm:$0xff] }
 0x137   :  { %v807_v5 = vld [vmem:[%s2582_s5 + $0xc8] sm:$0xff]  ;;  %v822_v7 = vld [vmem:[%s2582_s5 + $0x140] sm:$0xff]  ;;  %v808_v13 = vld [vmem:[%s2582_s5 + $0xd0] sm:$0xff] }
 0x138   :  { %1479 = vmatpush3.bf16.msra.mxu1 %v1478_v16  ;;  %v400_v16 = vld [vmem:[%s2580_s3 + $0x250] sm:$0xff]  ;;  %v1580_v6 = vpack.c.bf16 %v807_v5, %v806_v4  ;;  %v982_v4 = vld [vmem:[%s2584_s7 + $0x20] sm:$0xff]  ;;  %v983_v5 = vld [vmem:[%s2584_s7 + $0x28] sm:$0xff] }
 0x139   :  { %1481 = vmatprep.subr.bf16.mxu1 %v1480_v18  ;;  %v418_v18 = vld [vmem:[%s2580_s3 + $0x2e0] sm:$0xff]  ;;  %v1522_v20 = vpack.c.bf16 %v401_v17, %v400_v16  ;;  %v824_v16 = vld [vmem:[%s2582_s5 + $0x150] sm:$0xff]  ;;  %v825_v17 = vld [vmem:[%s2582_s5 + $0x158] sm:$0xff] }
 0x13a   :  { %v1524_v21 = vpack.c.bf16 %v419_v19, %v418_v18  ;;  %v792_v18 = vld [vmem:[%s2582_s5 + $0x50] sm:$0xff]  ;;  %v1612_v19 = vpack.c.bf16 %v825_v17, %v824_v16  ;;  %v990_v16 = vld [vmem:[%s2584_s7 + $0x60] sm:$0xff]  ;;  %v991_v17 = vld [vmem:[%s2584_s7 + $0x68] sm:$0xff] }
 0x13c   :  { %1483 = vmatpush3.bf16.msra.mxu1 %v1482_v23  ;;  %v403_v23 = vld [vmem:[%s2580_s3 + $0x268] sm:$0xff] }
 0x13d   :  { %1485 = vmatprep.subr.bf16.mxu1 %v1484_v24  ;;  %v420_v24 = vld [vmem:[%s2580_s3 + $0x2f0] sm:$0xff]  ;;  %v1526_v26 = vpack.c.bf16 %v403_v23, %v402_v22  ;;  %v810_v22 = vld [vmem:[%s2582_s5 + $0xe0] sm:$0xff]  ;;  %v811_v23 = vld [vmem:[%s2582_s5 + $0xe8] sm:$0xff] }
 0x13e   :  { %v1528_v27 = vpack.c.bf16 %v421_v25, %v420_v24  ;;  %v1588_v24 = vpack.c.bf16 %v811_v23, %v810_v22  ;;  %v826_v25 = vld [vmem:[%s2582_s5 + $0x160] sm:$0xff] }
 0x140   :  { %1487 = vmatpush3.bf16.msra.mxu1 %v1486_v29  ;;  %v405_v29 = vld [vmem:[%s2580_s3 + $0x278] sm:$0xff] }
 0x141   :  { %1489 = vmatprep.subr.bf16.mxu1 %v1488_v30  ;;  %v1530_v30 = vpack.c.bf16 %v405_v29, %v404_v28  ;;  %v795_v29 = vld [vmem:[%s2582_s5 + $0x68] sm:$0xff] }
 0x144   :  { %1491 = vmatpush3.bf16.msra.mxu1 %v1490_v36  ;;  %v1564_v36 = vpack.c.bf16 %v799_v33, %v798_v3  ;;  %v812_v3 = vld [vmem:[%s2582_s5 + $0xf0] sm:$0xff]  ;;  %v813_v33 = vld [vmem:[%s2582_s5 + $0xf8] sm:$0xff] }
 0x145   :  { %1493 = vmatprep.subr.bf16.mxu1 %v1492_v38  ;;  %v782_v38 = vld [vmem:[%s2582_s5] sm:$0xff] }
 0x146   :  { %v1566_v41 = vpack.c.bf16 %v783_v39, %v782_v38  ;;  %v796_v38 = vld [vmem:[%s2582_s5 + $0x70] sm:$0xff]  ;;  %v797_v39 = vld [vmem:[%s2582_s5 + $0x78] sm:$0xff] }
 0x148   :  { %1495 = vmatpush3.bf16.msra.mxu1 %v1494_v43  ;;  %v801_v43 = vld [vmem:[%s2582_s5 + $0x98] sm:$0xff] }
 0x149   :  { %1497 = vmatprep.subr.bf16.mxu1 %v1496_v44  ;;  %v816_v44 = vld [vmem:[%s2582_s5 + $0x110] sm:$0xff]  ;;  %v1568_v45 = vpack.c.bf16 %v801_v43, %v800_v42  ;;  %v1594_v42 = vpack.c.bf16 %v797_v39, %v796_v38 }
 0x14c   :  { %1499 = vmatpush3.bf16.msra.mxu1 %v1498_v49  ;;  %v1600_v49 = vpack.c.bf16 %v817_v46, %v816_v44 }
 0x14d   :  { %1501 = vmatprep.subr.bf16.mxu1 %v1500_v50  ;;  %v1570_v50 = vpack.c.bf16 %v785_v48, %v784_v47 }
 0x14f   :  { %629 = vmatmul.mubr.f32.vlgmr.msra.gmra.mrb[2].mxu1 %v2152_v32  ;;  %v413_v32 = vld [vmem:[%s2580_s3 + $0x2b8] sm:$0xff] }
 0x150   :  { %1503 = vmatpush3.bf16.msra.mxu1 %v1502_v55  ;;  %698 = vmatprep.mubr.f32.mxu1 %v2157_v37  ;;  %v1510_v37 = vpack.c.bf16 %v395_v0, %v394_v63  ;;  %v1512_v2 = vpack.c.bf16 %v413_v32, %v412_v1  ;;  %v819_v55 = vld [vmem:[%s2582_s5 + $0x128] sm:$0xff]  ;;  %v820_v63 = vld [vmem:[%s2582_s5 + $0x130] sm:$0xff]  ;;  %v821_v0 = vld [vmem:[%s2582_s5 + $0x138] sm:$0xff] }
 0x151   :  { %1505 = vmatprep.subr.bf16.mxu1 %v1504_v56  ;;  %v786_v56 = vld [vmem:[%s2582_s5 + $0x20] sm:$0xff]  ;;  %v1603_v60 = vpack.c.bf16 %v819_v55, %v818_v53  ;;  %v1606_v1 = vpack.c.bf16 %v821_v0, %v820_v63  ;;  %v788_v32 = vld [vmem:[%s2582_s5 + $0x30] sm:$0xff] }
 0x152   :  { %v980_v0 = vld [vmem:[%s2584_s7 + $0x10] sm:$0xff] }
 0x154   :  { %1507 = vmatpush3.bf16.msra.mxu1 %v1506_v61  ;;  %v1574_v61 = vpack.c.bf16 %v787_v57, %v786_v56 }
 0x155   :  { %1509 = vmatprep.subr.bf16.mxu1 %v1508_v62  ;;  %v1576_v62 = vpack.c.bf16 %v805_v59, %v804_v58 }
 0x158   :  { %1511 = vmatpush3.bf16.msra.mxu1 %v1510_v37  ;;  %v789_v37 = vld [vmem:[%s2582_s5 + $0x38] sm:$0xff] }
 0x159   :  { %1513 = vmatprep.subr.bf16.mxu1 %v1512_v2  ;;  %v1578_v2 = vpack.c.bf16 %v789_v37, %v788_v32 }
 0x15c   :  { %1515 = vmatpush3.bf16.msra.mxu1 %v1514_v8  ;;  %v823_v8 = vld [vmem:[%s2582_s5 + $0x148] sm:$0xff] }
 0x15d   :  { %1517 = vmatprep.subr.bf16.mxu1 %v1516_v9  ;;  %v790_v9 = vld [vmem:[%s2582_s5 + $0x40] sm:$0xff]  ;;  %v1609_v10 = vpack.c.bf16 %v823_v8, %v822_v7  ;;  %v984_v7 = vld [vmem:[%s2584_s7 + $0x30] sm:$0xff]  ;;  %v985_v8 = vld [vmem:[%s2584_s7 + $0x38] sm:$0xff] }
 0x15e   :  { %v1582_v12 = vpack.c.bf16 %v791_v11, %v790_v9  ;;  %v1630_v9 = vpack.c.bf16 %v985_v8, %v984_v7  ;;  %v987_v11 = vld [vmem:[%s2584_s7 + $0x48] sm:$0xff] }
 0x160   :  { %1519 = vmatpush3.bf16.msra.mxu1 %v1518_v14  ;;  %v809_v14 = vld [vmem:[%s2582_s5 + $0xd8] sm:$0xff] }
 0x161   :  { %1521 = vmatprep.subr.bf16.mxu1 %v1520_v15  ;;  %v1584_v15 = vpack.c.bf16 %v809_v14, %v808_v13  ;;  %v988_v13 = vld [vmem:[%s2584_s7 + $0x50] sm:$0xff]  ;;  %v989_v14 = vld [vmem:[%s2584_s7 + $0x58] sm:$0xff] }
 0x164   :  { %1523 = vmatpush3.bf16.msra.mxu1 %v1522_v20  ;;  %v793_v20 = vld [vmem:[%s2582_s5 + $0x58] sm:$0xff] }
 0x165   :  { %1525 = vmatprep.subr.bf16.mxu1 %v1524_v21  ;;  %v1586_v21 = vpack.c.bf16 %v793_v20, %v792_v18  ;;  %v1639_v18 = vpack.c.bf16 %v991_v17, %v990_v16  ;;  %v993_v20 = vld [vmem:[%s2584_s7 + $0x78] sm:$0xff] }
 0x168   :  { %1527 = vmatpush3.bf16.msra.mxu1 %v1526_v26  ;;  %v827_v26 = vld [vmem:[%s2582_s5 + $0x168] sm:$0xff] }
 0x169   :  { %1529 = vmatprep.subr.bf16.mxu1 %v1528_v27  ;;  %v794_v27 = vld [vmem:[%s2582_s5 + $0x60] sm:$0xff]  ;;  %v1615_v28 = vpack.c.bf16 %v827_v26, %v826_v25 }
 0x16a   :  { %v1083_v25 = vld [vmem:[%s2585_s6] ss:$0 sm:$0xff] }
 0x16c   :  { %1531 = vmatpush3.bf16.msra.mxu1 %v1530_v30  ;;  %v1590_v30 = vpack.c.bf16 %v795_v29, %v794_v27 }
 0x16d   :  { %1565 = vmatprep.subr.bf16.mxu1 %v1564_v36  ;;  %v1592_v36 = vpack.c.bf16 %v813_v33, %v812_v3 }
 0x16f   :  { %699 = vmatmul.mubr.f32.vlgmr.msra.gmra.mrb[4].mxu1 %v2155_v35  ;;  %v815_v35 = vld [vmem:[%s2582_s5 + $0x108] sm:$0xff] }
 0x170   :  { %v1597_v40 = vpack.c.bf16 %v815_v35, %v814_v34  ;;  %1567 = vmatpush3.bf16.msra.mxu1 %v1566_v41  ;;  %v828_v34 = vld [vmem:[%s2582_s5 + $0x170] sm:$0xff]  ;;  %v829_v35 = vld [vmem:[%s2582_s5 + $0x178] sm:$0xff] }
 0x171   :  { %1569 = vmatprep.subr.bf16.mxu1 %v1568_v45  ;;  %v1618_v41 = vpack.c.bf16 %v829_v35, %v828_v34 }
 0x172   :  { %1598 = vmatpush3.bf16.msra.mxu0 %v1597_v40  ;;  %v1655_v40 = vld [vmem:[#allocation2] sm:$0xff] }
 0x173   :  { %1599 = vmatprep.subr.bf16.mxu0 %v1657_v31  ;;  %1326 = vmatprep.mubr.msk.f32.mxu0 %vm1658_vm3, %v1655_v40 }
 0x174   :  { %1571 = vmatpush3.bf16.msra.mxu1 %v1570_v50 }
 0x175   :  { %1573 = vmatprep.subr.bf16.mxu1 %v1572_v54 }
 0x176   :  { %1601 = vmatpush3.bf16.msra.mxu0 %v1600_v49  ;;  %v1078_v49 = vld [vmem:[%s2583_s4] ss:$0 sm:$0xff] }
 0x177   :  { %1602 = vmatprep.subr.bf16.mxu0 %v1657_v31 }
 0x178   :  { %1575 = vmatpush3.bf16.msra.mxu1 %v1574_v61  ;;  %v978_v61 = vld [vmem:[%s2584_s7] sm:$0xff] }
 0x179   :  { %1577 = vmatprep.subr.bf16.mxu1 %v1576_v62  ;;  %v979_v62 = vld [vmem:[%s2584_s7 + $0x8] sm:$0xff] }
 0x17a   :  { %1604 = vmatpush3.bf16.msra.mxu0 %v1603_v60  ;;  %v1621_v63 = vpack.c.bf16 %v979_v62, %v978_v61 }
 0x17b   :  { %1605 = vmatprep.subr.bf16.mxu0 %v1657_v31 }
 0x17c   :  { %1579 = vmatpush3.bf16.msra.mxu1 %v1578_v2 }
 0x17d   :  { %1581 = vmatprep.subr.bf16.mxu1 %v1580_v6  ;;  %v1627_v6 = vpack.c.bf16 %v983_v5, %v982_v4 }
 0x17e   :  { %1607 = vmatpush3.bf16.msra.mxu0 %v1606_v1  ;;  %v981_v1 = vld [vmem:[%s2584_s7 + $0x18] sm:$0xff] }
 0x17f   :  { %1608 = vmatprep.subr.bf16.mxu0 %v1657_v31  ;;  %v1624_v2 = vpack.c.bf16 %v981_v1, %v980_v0 }
 0x180   :  { %1583 = vmatpush3.bf16.msra.mxu1 %v1582_v12 }
 0x181   :  { %1585 = vmatprep.subr.bf16.mxu1 %v1584_v15  ;;  %v1636_v15 = vpack.c.bf16 %v989_v14, %v988_v13 }
 0x182   :  { %1610 = vmatpush3.bf16.msra.mxu0 %v1609_v10  ;;  %v986_v10 = vld [vmem:[%s2584_s7 + $0x40] sm:$0xff] }
 0x183   :  { %1611 = vmatprep.subr.bf16.mxu0 %v1657_v31  ;;  %v1633_v12 = vpack.c.bf16 %v987_v11, %v986_v10 }
 0x184   :  { %1587 = vmatpush3.bf16.msra.mxu1 %v1586_v21 }
 0x185   :  { %1589 = vmatprep.subr.bf16.mxu1 %v1588_v24 }
 0x186   :  { %1613 = vmatpush3.bf16.msra.mxu0 %v1612_v19  ;;  %v992_v19 = vld [vmem:[%s2584_s7 + $0x70] sm:$0xff] }
 0x187   :  { %1614 = vmatprep.subr.bf16.mxu0 %v1657_v31  ;;  %v1642_v21 = vpack.c.bf16 %v993_v20, %v992_v19 }
 0x188   :  { %1591 = vmatpush3.bf16.msra.mxu1 %v1590_v30  ;;  %v1084_v30 = vld [vmem:[%s2586_s8] ss:$0 sm:$0xff] }
 0x189   :  { %1593 = vmatprep.subr.bf16.mxu1 %v1592_v36 }
 0x18a   :  { %1616 = vmatpush3.bf16.msra.mxu0 %v1615_v28 }
 0x18b   :  { %1617 = vmatprep.subr.bf16.mxu0 %v1657_v31 }
 0x18c   :  { %1595 = vmatpush3.bf16.msra.mxu1 %v1594_v42 }
 0x18d   :  { %1620 = vmatprep.subr.bf16.mxu1 %v1657_v31 }
 0x18e   :  { %1619 = vmatpush3.bf16.msra.mxu0 %v1618_v41 }
 0x202   :  { %v1117_v43 = vpop.f32.mrb[0].mxu1 }
 0x203   :  { %v1118_v44 = vpop.f32.mrb[1].mxu1 }
 0x204   :  { %v1119_v45 = vadd.f32 %v1118_v44, %v1117_v43 }
 0x206   :  { %v561_v52 = vadd.f32 %v1119_v45, %v1078_v49 }
 0x209   :  { %v1222_v46 = vpop.f32.mrb[4].mxu0 }
 0x20a   :  { %v1223_v47 = vpop.f32.mrb[5].mxu0 }
 0x20b   :  { %v1224_v48 = vadd.f32 %v1223_v47, %v1222_v46 }
 0x222   :  { %v1152_v50 = vpop.f32.mrb[2].mxu1 }
 0x223   :  { %v1153_v51 = vpop.f32.mrb[3].mxu1 }
 0x224   :  { %v1154_v53 = vadd.f32 %v1153_v51, %v1152_v50 }
 0x226   :  { %v631_v54 = vadd.f32 %v1154_v53, %v561_v52 }
 0x242   :  { %v1187_v55 = vpop.f32.mrb[4].mxu1 }
 0x243   :  { %v1188_v56 = vpop.f32.mrb[5].mxu1 }
 0x244   :  { %v1189_v57 = vadd.f32 %v1188_v56, %v1187_v55 }
 0x246   :  { %v701_v58 = vadd.f32 %v1189_v57, %v631_v54 }
 0x248   :  { %v771_v59 = vadd.f32 %v1224_v48, %v701_v58 }
 0x24a   :  { %v774_v60 = vmax.f32 %v771_v59, 0.0 }
 0x24c   :  { %778 = vst [vmem:[#allocation3 + $0x8] sm:$0xff] %v774_v60  ;;  %901 = vmatprep.mubr.f32.mxu1 %v774_v60 }
 0x253   :  { %v781_v32 = vld [vmem:[#allocation3 + $0xa] sm:$0xff] }
 0x254   :  { %v779_v37 = vld [vmem:[#allocation3 + $0x6] sm:$0xff]  ;;  %1327 = vmatmul.mubr.f32.vlgmr.msra.gmra.mrb[6].mxu0 %v781_v32 }
 0x255   :  { %902 = vmatmul.mubr.f32.vlgmr.msra.gmra.mrb[6].mxu1 %v779_v37 }
 0x256   :  { %1622 = vmatpush3.bf16.msra.mxu1 %v1621_v63  ;;  %1361 = vmatprep.mubr.msk.f32.mxu1 %vm1658_vm3, %v1655_v40 }
 0x257   :  { %1623 = vmatprep.subr.bf16.mxu1 %v1657_v31 }
 0x25a   :  { %1625 = vmatpush3.bf16.msra.mxu1 %v1624_v2 }
 0x25b   :  { %1626 = vmatprep.subr.bf16.mxu1 %v1657_v31 }
 0x25e   :  { %1628 = vmatpush3.bf16.msra.mxu1 %v1627_v6 }
 0x25f   :  { %1629 = vmatprep.subr.bf16.mxu1 %v1657_v31 }
 0x262   :  { %1631 = vmatpush3.bf16.msra.mxu1 %v1630_v9 }
 0x263   :  { %1632 = vmatprep.subr.bf16.mxu1 %v1657_v31 }
 0x266   :  { %1634 = vmatpush3.bf16.msra.mxu1 %v1633_v12 }
 0x267   :  { %1635 = vmatprep.subr.bf16.mxu1 %v1657_v31 }
 0x26a   :  { %1637 = vmatpush3.bf16.msra.mxu1 %v1636_v15 }
 0x26b   :  { %1638 = vmatprep.subr.bf16.mxu1 %v1657_v31 }
 0x26e   :  { %1640 = vmatpush3.bf16.msra.mxu1 %v1639_v18 }
 0x26f   :  { %1641 = vmatprep.subr.bf16.mxu1 %v1657_v31 }
 0x272   :  { %1643 = vmatpush3.bf16.msra.mxu1 %v1642_v21 }
 0x327   :  { %v973_v22 = vpop.f32.mrb[6].mxu0 }
 0x328   :  { %v1257_v23 = vpop.f32.mrb[6].mxu1  ;;  %v1328_v24 = vpop.f32.mrb[7].mxu0 }
 0x329   :  { %v1258_v26 = vpop.f32.mrb[7].mxu1 }
 0x32a   :  { %v1259_v27 = vadd.f32 %v1258_v26, %v1257_v23 }
 0x32c   :  { %v904_v31 = vadd.f32 %v1259_v27, %v1083_v25 }
 0x32e   :  { %v974_v28 = vadd.f32 %v973_v22, %v904_v31 }
 0x330   :  { %v977_v29 = vmax.f32 %v974_v28, 0.0 }
 0x332   :  { %1362 = vmatmul.mubr.f32.vlgmr.msra.gmra.mrb[8].mxu1 %v977_v29 }
 0x405   :  { %v1067_v3 = vpop.f32.mrb[8].mxu1 }
 0x406   :  { %v1068_v33 = vadd.f32 %v1084_v30, %v1067_v3  ;;  %v1363_v34 = vpop.f32.mrb[9].mxu1 }
 0x408   :  { %1071 = vst [vmem:[%s2587_s9] sm:$0xff] %v1068_v33 }

</bundles_post_ra>
